<compile_context>
chip_gen: v7x
topology: tpu7x:2x2x1
jax: 0.10.0
libtpu: 0.0.40
codegen_flags: <defaults>
</compile_context>

<pallas_src>
import functools

import numpy as np
import jax
import jax.numpy as jnp
from jax.experimental import pallas as pl
from jax.experimental.pallas import tpu as pltpu

EPS = 1e-5        # nn.BatchNorm1d default
_LANE = 128       # vreg lane width  -> pad feature dims to this
_SUBLANE = 8      # f32 sublane width


def _round_up(x, m):
    return (x + m - 1) // m * m


def _pad2d(a, rows, cols):
    return jnp.pad(a, ((0, rows - a.shape[0]), (0, cols - a.shape[1])))


def _full_spec(shape):
    return pl.BlockSpec(shape, lambda: (0,) * len(shape))


@functools.lru_cache(maxsize=None)
def _vmem_budget():
    """Generation-aware VMEM budget (~78% of physical: ~100 MiB v5e/v6e, ~50 MiB v7x)."""
    cap = 64 * 1024 * 1024  # conservative fallback = v7x physical VMEM
    try:
        cap = int(getattr(pltpu.get_tpu_info(), "vmem_capacity_bytes", cap))
    except Exception:
        pass
    return (cap // 32) * 25


# ----------------------------------------------------------------------------
# Fused kernel
# ----------------------------------------------------------------------------
def _make_fused_mlp_kernel(num_layers, shapes, n_actual, n_pad, compute_dtype):
    """kernel(x, w_0..w_{L-1} (HBM), gamma/beta per hidden layer, b_last, out, wbuf, sems)."""
    n_hidden = num_layers - 1

    def kernel(*refs):
        x_ref = refs[0]
        w_hbm = refs[1:1 + num_layers]
        base = 1 + num_layers
        gb = refs[base:base + 2 * n_hidden]
        b_ref = refs[base + 2 * n_hidden]
        o_ref = refs[base + 2 * n_hidden + 1]
        wbuf = refs[base + 2 * n_hidden + 2]
        sem = refs[base + 2 * n_hidden + 3]

        def start_weight_dma(layer):
            ip, op = shapes[layer]
            slot = layer % 2
            cp = pltpu.make_async_copy(w_hbm[layer], wbuf.at[slot, :ip, :op], sem.at[slot])
            cp.start()
            return cp

        copies = [None] * num_layers
        copies[0] = start_weight_dma(0)

        if n_hidden:
            inv_n = jnp.float32(1.0 / n_actual)
            if n_pad != n_actual:
                # Masked "ones" row: padded batch rows contribute 0 to the BN stats,
                # so no per-layer row-mask select is needed anywhere.
                ones_row = (jax.lax.broadcasted_iota(jnp.int32, (1, n_pad), 1)
                            < n_actual).astype(jnp.float32)
            else:
                ones_row = jnp.ones((1, n_pad), jnp.float32)

        h = x_ref[...]                                   # compute_dtype activations
        for l in range(n_hidden):                        # static unroll
            ip, op = shapes[l]
            # Prefetch next layer's weight while this layer computes (double buffer).
            copies[l + 1] = start_weight_dma(l + 1)
            copies[l].wait()
            w = wbuf[l % 2, :ip, :op]
            # Hidden Linear bias is dropped: BN subtracts the per-feature batch mean,
            # so a constant-per-feature bias cancels exactly.
            z = jnp.dot(h, w, preferred_element_type=jnp.float32)          # MXU, f32 acc
            # BN batch stats on the MXU (idle when M is small); two-pass variance.
            mean = jnp.dot(ones_row, z, preferred_element_type=jnp.float32) * inv_n
            zc = z - mean
            var = jnp.dot(ones_row, zc * zc, preferred_element_type=jnp.float32) * inv_n
            scale = jax.lax.rsqrt(var + EPS) * gb[2 * l][...]
            # ReLU fused with the single cast back to compute dtype; dropout(p=0) = identity.
            h = jnp.maximum(zc * scale + gb[2 * l + 1][...], 0.0).astype(compute_dtype)

        # Final Linear keeps its bias.
        ip, op = shapes[num_layers - 1]
        copies[num_layers - 1].wait()
        w = wbuf[(num_layers - 1) % 2, :ip, :op]
        out = jnp.dot(h, w, preferred_element_type=jnp.float32) + b_ref[...]
        o_ref[...] = out.astype(o_ref.dtype)

    return kernel


# ----------------------------------------------------------------------------
# One-time parameter preparation (padding / casting outside the per-call path)
# ----------------------------------------------------------------------------
def prepare_params(params, num_layers, compute_dtype=jnp.bfloat16):
    cdt = np.dtype(compute_dtype)
    prep = {"w": [], "gamma": [], "beta": [], "b_last": None}
    for layer in range(num_layers):
        w_t, b = params["linears"][layer]
        ip = _round_up(w_t.shape[0], _LANE)
        op = _round_up(w_t.shape[1], _LANE)
        prep["w"].append(_pad2d(w_t, ip, op).astype(cdt))
        if layer < num_layers - 1:
            gamma, beta = params["bns"][layer]       # hidden bias dropped (cancels under BN)
            prep["gamma"].append(_pad2d(gamma, 1, op).astype(jnp.float32))
            prep["beta"].append(_pad2d(beta, 1, op).astype(jnp.float32))
        else:
            prep["b_last"] = _pad2d(b, 1, op).astype(jnp.float32)
    return prep


# ----------------------------------------------------------------------------
# Wrapper: padding x, specs, single pallas_call
# ----------------------------------------------------------------------------
@functools.partial(jax.jit,
                   static_argnames=("num_layers", "output_dim", "compute_dtype", "out_dtype"))
def mlp_forward(prep, x, *, num_layers, output_dim,
                compute_dtype=jnp.bfloat16, out_dtype=jnp.float32):
    cdt = np.dtype(compute_dtype)
    odt = np.dtype(out_dtype)
    cbytes, obytes = cdt.itemsize, odt.itemsize

    n, fin = x.shape
    shapes = tuple((int(w.shape[0]), int(w.shape[1])) for w in prep["w"])
    assert len(shapes) == num_layers
    fin_pad, fout_pad = shapes[0][0], shapes[-1][1]
    assert fin <= fin_pad and output_dim <= fout_pad
    max_ip = max(s[0] for s in shapes)
    max_op = max(s[1] for s in shapes)

    # bf16 vregs pack [16,128]; keep 8-row padding on the f32 path.
    sub = 16 if cbytes == 2 else _SUBLANE
    n_pad = _round_up(n, sub)

    x_p = _pad2d(x, n_pad, fin_pad).astype(cdt)

    inputs, in_specs = [x_p], [_full_spec((n_pad, fin_pad))]
    for w in prep["w"]:                         # weights stay in HBM; kernel DMAs them
        inputs.append(w)
        in_specs.append(pl.BlockSpec(memory_space=pl.ANY))
    for g, b in zip(prep["gamma"], prep["beta"]):
        inputs += [g, b]
        in_specs += [_full_spec(g.shape), _full_spec(b.shape)]
    inputs.append(prep["b_last"])
    in_specs.append(_full_spec(prep["b_last"].shape))

    # VMEM footprint estimate (inputs/output + weight double-buffer + f32 temporaries).
    budget = _vmem_budget()
    act_cols = max(max_op, fin_pad)
    vmem_est = (
        2 * n_pad * fin_pad * cbytes                          # x
        + 2 * max_ip * max_op * cbytes                        # weight double buffer
        + (num_layers - 1) * 2 * 2 * _SUBLANE * max_op * 4    # gamma/beta
        + 2 * _SUBLANE * fout_pad * 4                         # final bias
        + 2 * n_pad * fout_pad * obytes                       # output
        + n_pad * act_cols * (cbytes + 3 * 4)                 # live h + f32 z / centered / sq
    )
    if vmem_est > budget:
        # TODO(synk): batch-tiled grid (parallel batch axis, resident weights) with a
        # two-pass / accumulator BN for shapes that exceed VMEM residency.
        raise ValueError(
            f"MLP footprint ~{vmem_est / 2**20:.1f} MiB exceeds VMEM budget "
            f"{budget / 2**20:.1f} MiB; batch-tiled path not implemented.")

    flops = 0
    for l, (ip, op) in enumerate(shapes):
        flops += 2 * n_pad * ip * op
        if l < num_layers - 1:
            flops += 4 * n_pad * op                 # the two MXU stat reductions
    bytes_accessed = (
        n_pad * fin_pad * cbytes
        + sum(int(w.size) for w in prep["w"]) * cbytes
        + sum(int(g.size) + int(b.size) for g, b in zip(prep["gamma"], prep["beta"])) * 4
        + int(prep["b_last"].size) * 4
        + n_pad * fout_pad * obytes)
    cost = pl.CostEstimate(flops=int(flops),
                           transcendentals=int((num_layers - 1) * max_op),
                           bytes_accessed=int(bytes_accessed))

    kernel = _make_fused_mlp_kernel(num_layers, shapes, n, n_pad, cdt)

    # TODO(synk): single-TensorCore kernel; a v7x megacore split needs either a feature-sliced
    # grid or a cross-core BN stat merge via VMEM_SHARED/CMEM.
    out_p = pl.pallas_call(
        kernel,
        grid=(),
        out_shape=jax.ShapeDtypeStruct((n_pad, fout_pad), odt),
        in_specs=in_specs,
        out_specs=_full_spec((n_pad, fout_pad)),
        scratch_shapes=[pltpu.VMEM((2, max_ip, max_op), cdt),
                        pltpu.SemaphoreType.DMA((2,))],
        compiler_params=pltpu.CompilerParams(vmem_limit_bytes=int(budget)),
        cost_estimate=cost,
    )(*inputs)

    return out_p[:n, :output_dim]


# ----------------------------------------------------------------------------
# Parameter construction + pure-JAX reference (PyTorch forward semantics)
# ----------------------------------------------------------------------------
def init_mlp_params(key, num_layers, input_dim, hidden_dim, output_dim):
    """Deterministic synthetic parameters (shapes match the PyTorch module, reset_param-style)."""
    if num_layers < 1:
        raise ValueError("number of layers should be positive!")
    dims = (
        [(input_dim, output_dim)]
        if num_layers == 1
        else [(input_dim, hidden_dim)]
        + [(hidden_dim, hidden_dim)] * (num_layers - 2)
        + [(hidden_dim, output_dim)]
    )
    params = {"linears": [], "bns": []}
    for fin, fout in dims:
        key, kw, kb = jax.random.split(key, 3)
        # PyTorch nn.Linear weight is (fout, fin); store pre-transposed (fin, fout).
        w_t = jax.random.uniform(kw, (fin, fout), jnp.float32, -0.3, -0.2)
        b = jax.random.uniform(kb, (1, fout), jnp.float32, -0.3, -0.2)
        params["linears"].append((w_t, b))
    for _ in range(max(num_layers - 1, 0)):
        key, kg, kb = jax.random.split(key, 3)
        gamma = jax.random.uniform(kg, (1, hidden_dim), jnp.float32, 0.5, 1.5)
        beta = jax.random.uniform(kb, (1, hidden_dim), jnp.float32, -0.5, 0.5)
        params["bns"].append((gamma, beta))
    # TODO(synk): self.input_norm exists in __init__ but is unused in forward; omitted.
    return params


def mlp_forward_ref(params, x, num_layers):
    """Full-precision reference with exact PyTorch forward semantics (bias kept)."""
    hp = jax.lax.Precision.HIGHEST
    h = x
    for layer in range(num_layers - 1):
        w_t, b = params["linears"][layer]
        gamma, beta = params["bns"][layer]
        h = jnp.dot(h, w_t, precision=hp) + b
        mean = h.mean(axis=0, keepdims=True)
        var = ((h - mean) ** 2).mean(axis=0, keepdims=True)   # biased (training-mode BN)
        h = (h - mean) * jax.lax.rsqrt(var + EPS) * gamma + beta
        h = jnp.maximum(h, 0.0)
    w_t, b = params["linears"][num_layers - 1]
    return jnp.dot(h, w_t, precision=hp) + b


if __name__ == "__main__":
    num_layers = 3
    batch, input_dim, hidden_dim, output_dim = 8, 16, 32, 8

    key = jax.random.PRNGKey(0)
    key, kx = jax.random.split(key)
    x = jax.random.normal(kx, (batch, input_dim), dtype=jnp.float32)

    params = init_mlp_params(key, num_layers, input_dim, hidden_dim, output_dim)
    ref = mlp_forward_ref(params, x, num_layers)

    # Exact-semantics check: f32 MXU path vs. the PyTorch-style reference (also validates
    # the bias-drop, masked MXU batch stats and two-pass variance rewrites).
    prep_f32 = prepare_params(params, num_layers, jnp.float32)
    out_f32 = jax.block_until_ready(
        mlp_forward(prep_f32, x, num_layers=num_layers, output_dim=output_dim,
                    compute_dtype=jnp.float32, out_dtype=jnp.float32))
    assert out_f32.shape == (batch, output_dim)
    assert jnp.allclose(out_f32, ref, atol=2e-3, rtol=2e-3), "f32 path mismatch"

    # Performance path: bf16 weights/activations on the MXU (f32 accumulation + f32 BN math),
    # bf16 output, batch padded to 16 rows.
    prep_bf16 = prepare_params(params, num_layers, jnp.bfloat16)
    out_bf16 = jax.block_until_ready(
        mlp_forward(prep_bf16, x, num_layers=num_layers, output_dim=output_dim,
                    compute_dtype=jnp.bfloat16, out_dtype=jnp.bfloat16))
    assert out_bf16.shape == (batch, output_dim)
    assert jnp.allclose(out_bf16.astype(jnp.float32), ref, atol=2e-1, rtol=5e-2), \
        "bf16 path mismatch"

    print("KERNEL_OK")
</pallas_src>

<mosaic_0001>
module attributes {stable_mosaic.version = 11 : i64} {
  func.func @kernel(%arg0: memref<8x128xf32, #tpu.memory_space<vmem>>, %arg1: memref<128x128xf32, #tpu.memory_space<any>>, %arg2: memref<128x128xf32, #tpu.memory_space<any>>, %arg3: memref<128x128xf32, #tpu.memory_space<any>>, %arg4: memref<1x128xf32, #tpu.memory_space<vmem>>, %arg5: memref<1x128xf32, #tpu.memory_space<vmem>>, %arg6: memref<1x128xf32, #tpu.memory_space<vmem>>, %arg7: memref<1x128xf32, #tpu.memory_space<vmem>>, %arg8: memref<1x128xf32, #tpu.memory_space<vmem>>, %arg9: memref<8x128xf32, #tpu.memory_space<vmem>>, %arg10: memref<2x128x128xf32, #tpu.memory_space<vmem>>, %arg11: memref<2x!tpu.dma_semaphore, #tpu.memory_space<semaphore_mem>>) attributes {dimension_semantics = [], scalar_prefetch = 0 : i64, scratch_operands = 2 : i64, tpu.core_type = #tpu.core_type<tc>} {
    %c0_i32 = arith.constant 0 : i32
    %c0_i32_0 = arith.constant 0 : i32
    %c0_i32_1 = arith.constant 0 : i32
    %c0_i32_2 = arith.constant 0 : i32
    %0 = tpu.memref_slice %arg10[%c0_i32, %c0_i32_1, %c0_i32_2] : memref<2x128x128xf32, #tpu.memory_space<vmem>> -> memref<1x128x128xf32, #tpu.memory_space<vmem>>
    %1 = tpu.memref_squeeze %0 : memref<1x128x128xf32, #tpu.memory_space<vmem>> -> memref<128x128xf32, #tpu.memory_space<vmem>>
    %2 = tpu.memref_slice %arg11[%c0_i32_0] : memref<2x!tpu.dma_semaphore, #tpu.memory_space<semaphore_mem>> -> memref<1x!tpu.dma_semaphore, #tpu.memory_space<semaphore_mem>>
    %3 = tpu.memref_squeeze %2 : memref<1x!tpu.dma_semaphore, #tpu.memory_space<semaphore_mem>> -> memref<!tpu.dma_semaphore, #tpu.memory_space<semaphore_mem>>
    tpu.enqueue_dma source(%arg1 : memref<128x128xf32, #tpu.memory_space<any>>) target(%1 : memref<128x128xf32, #tpu.memory_space<vmem>>) target_semaphore(%3 : memref<!tpu.dma_semaphore, #tpu.memory_space<semaphore_mem>>)
    %cst = arith.constant 1.000000e+00 : f32
    %4 = vector.broadcast %cst : f32 to vector<1x8xf32>
    %c0 = arith.constant 0 : index
    %c0_3 = arith.constant 0 : index
    %5 = vector.load %arg0[%c0, %c0_3] : memref<8x128xf32, #tpu.memory_space<vmem>>, vector<8x128xf32>
    %c1_i32 = arith.constant 1 : i32
    %c1_i32_4 = arith.constant 1 : i32
    %c0_i32_5 = arith.constant 0 : i32
    %c0_i32_6 = arith.constant 0 : i32
    %6 = tpu.memref_slice %arg10[%c1_i32, %c0_i32_5, %c0_i32_6] : memref<2x128x128xf32, #tpu.memory_space<vmem>> -> memref<1x128x128xf32, #tpu.memory_space<vmem>>
    %7 = tpu.memref_squeeze %6 : memref<1x128x128xf32, #tpu.memory_space<vmem>> -> memref<128x128xf32, #tpu.memory_space<vmem>>
    %8 = tpu.memref_slice %arg11[%c1_i32_4] : memref<2x!tpu.dma_semaphore, #tpu.memory_space<semaphore_mem>> -> memref<1x!tpu.dma_semaphore, #tpu.memory_space<semaphore_mem>>
    %9 = tpu.memref_squeeze %8 : memref<1x!tpu.dma_semaphore, #tpu.memory_space<semaphore_mem>> -> memref<!tpu.dma_semaphore, #tpu.memory_space<semaphore_mem>>
    tpu.enqueue_dma source(%arg2 : memref<128x128xf32, #tpu.memory_space<any>>) target(%7 : memref<128x128xf32, #tpu.memory_space<vmem>>) target_semaphore(%9 : memref<!tpu.dma_semaphore, #tpu.memory_space<semaphore_mem>>)
    %c0_i32_7 = arith.constant 0 : i32
    %c0_i32_8 = arith.constant 0 : i32
    %c0_i32_9 = arith.constant 0 : i32
    %c0_i32_10 = arith.constant 0 : i32
    %10 = tpu.memref_slice %arg10[%c0_i32_7, %c0_i32_9, %c0_i32_10] : memref<2x128x128xf32, #tpu.memory_space<vmem>> -> memref<1x128x128xf32, #tpu.memory_space<vmem>>
    %11 = tpu.memref_squeeze %10 : memref<1x128x128xf32, #tpu.memory_space<vmem>> -> memref<128x128xf32, #tpu.memory_space<vmem>>
    %12 = tpu.memref_slice %arg11[%c0_i32_8] : memref<2x!tpu.dma_semaphore, #tpu.memory_space<semaphore_mem>> -> memref<1x!tpu.dma_semaphore, #tpu.memory_space<semaphore_mem>>
    %13 = tpu.memref_squeeze %12 : memref<1x!tpu.dma_semaphore, #tpu.memory_space<semaphore_mem>> -> memref<!tpu.dma_semaphore, #tpu.memory_space<semaphore_mem>>
    tpu.wait_dma2 semaphore(%13 : memref<!tpu.dma_semaphore, #tpu.memory_space<semaphore_mem>>) src(%arg1 : memref<128x128xf32, #tpu.memory_space<any>>) dst(%11 : memref<128x128xf32, #tpu.memory_space<vmem>>)
    %c0_11 = arith.constant 0 : index
    %c0_12 = arith.constant 0 : index
    %c0_13 = arith.constant 0 : index
    %14 = vector.load %arg10[%c0_11, %c0_12, %c0_13] : memref<2x128x128xf32, #tpu.memory_space<vmem>>, vector<1x128x128xf32>
    %15 = vector.shape_cast %14 : vector<1x128x128xf32> to vector<128x128xf32>
    %cst_14 = arith.constant dense<0.000000e+00> : vector<8x128xf32>
    %16 = tpu.matmul %5, %15, %cst_14 {dimension_numbers = #tpu.dot_dimension_numbers<[1], [0], [0], [1], [0, 0, 1, 1], [], []>} : vector<8x128xf32>, vector<128x128xf32>, vector<8x128xf32> -> vector<8x128xf32>
    %cst_15 = arith.constant dense<0.000000e+00> : vector<1x128xf32>
    %17 = tpu.matmul %4, %16, %cst_15 {dimension_numbers = #tpu.dot_dimension_numbers<[1], [0], [0], [1], [0, 0, 1, 1], [], []>} : vector<1x8xf32>, vector<8x128xf32>, vector<1x128xf32> -> vector<1x128xf32>
    %cst_16 = arith.constant 1.250000e-01 : f32
    %18 = vector.broadcast %cst_16 : f32 to vector<1x128xf32>
    %19 = arith.mulf %17, %18 : vector<1x128xf32>
    %20 = vector.broadcast %19 : vector<1x128xf32> to vector<8x128xf32>
    %21 = arith.subf %16, %20 : vector<8x128xf32>
    %22 = arith.mulf %21, %21 : vector<8x128xf32>
    %cst_17 = arith.constant dense<0.000000e+00> : vector<1x128xf32>
    %23 = tpu.matmul %4, %22, %cst_17 {dimension_numbers = #tpu.dot_dimension_numbers<[1], [0], [0], [1], [0, 0, 1, 1], [], []>} : vector<1x8xf32>, vector<8x128xf32>, vector<1x128xf32> -> vector<1x128xf32>
    %cst_18 = arith.constant 1.250000e-01 : f32
    %24 = vector.broadcast %cst_18 : f32 to vector<1x128xf32>
    %25 = arith.mulf %23, %24 : vector<1x128xf32>
    %cst_19 = arith.constant 9.99999974E-6 : f32
    %26 = vector.broadcast %cst_19 : f32 to vector<1x128xf32>
    %27 = arith.addf %25, %26 : vector<1x128xf32>
    %28 = math.rsqrt %27 : vector<1x128xf32>
    %c0_20 = arith.constant 0 : index
    %c0_21 = arith.constant 0 : index
    %29 = vector.load %arg4[%c0_20, %c0_21] : memref<1x128xf32, #tpu.memory_space<vmem>>, vector<1x128xf32>
    %30 = arith.mulf %28, %29 : vector<1x128xf32>
    %31 = vector.broadcast %30 : vector<1x128xf32> to vector<8x128xf32>
    %32 = arith.mulf %21, %31 : vector<8x128xf32>
    %c0_22 = arith.constant 0 : index
    %c0_23 = arith.constant 0 : index
    %33 = vector.load %arg5[%c0_22, %c0_23] : memref<1x128xf32, #tpu.memory_space<vmem>>, vector<1x128xf32>
    %34 = vector.broadcast %33 : vector<1x128xf32> to vector<8x128xf32>
    %35 = arith.addf %32, %34 : vector<8x128xf32>
    %cst_24 = arith.constant 0.000000e+00 : f32
    %36 = vector.broadcast %cst_24 : f32 to vector<8x128xf32>
    %37 = arith.maximumf %35, %36 : vector<8x128xf32>
    %c0_i32_25 = arith.constant 0 : i32
    %c0_i32_26 = arith.constant 0 : i32
    %c0_i32_27 = arith.constant 0 : i32
    %c0_i32_28 = arith.constant 0 : i32
    %38 = tpu.memref_slice %arg10[%c0_i32_25, %c0_i32_27, %c0_i32_28] : memref<2x128x128xf32, #tpu.memory_space<vmem>> -> memref<1x128x128xf32, #tpu.memory_space<vmem>>
    %39 = tpu.memref_squeeze %38 : memref<1x128x128xf32, #tpu.memory_space<vmem>> -> memref<128x128xf32, #tpu.memory_space<vmem>>
    %40 = tpu.memref_slice %arg11[%c0_i32_26] : memref<2x!tpu.dma_semaphore, #tpu.memory_space<semaphore_mem>> -> memref<1x!tpu.dma_semaphore, #tpu.memory_space<semaphore_mem>>
    %41 = tpu.memref_squeeze %40 : memref<1x!tpu.dma_semaphore, #tpu.memory_space<semaphore_mem>> -> memref<!tpu.dma_semaphore, #tpu.memory_space<semaphore_mem>>
    tpu.enqueue_dma source(%arg3 : memref<128x128xf32, #tpu.memory_space<any>>) target(%39 : memref<128x128xf32, #tpu.memory_space<vmem>>) target_semaphore(%41 : memref<!tpu.dma_semaphore, #tpu.memory_space<semaphore_mem>>)
    %c1_i32_29 = arith.constant 1 : i32
    %c1_i32_30 = arith.constant 1 : i32
    %c0_i32_31 = arith.constant 0 : i32
    %c0_i32_32 = arith.constant 0 : i32
    %42 = tpu.memref_slice %arg10[%c1_i32_29, %c0_i32_31, %c0_i32_32] : memref<2x128x128xf32, #tpu.memory_space<vmem>> -> memref<1x128x128xf32, #tpu.memory_space<vmem>>
    %43 = tpu.memref_squeeze %42 : memref<1x128x128xf32, #tpu.memory_space<vmem>> -> memref<128x128xf32, #tpu.memory_space<vmem>>
    %44 = tpu.memref_slice %arg11[%c1_i32_30] : memref<2x!tpu.dma_semaphore, #tpu.memory_space<semaphore_mem>> -> memref<1x!tpu.dma_semaphore, #tpu.memory_space<semaphore_mem>>
    %45 = tpu.memref_squeeze %44 : memref<1x!tpu.dma_semaphore, #tpu.memory_space<semaphore_mem>> -> memref<!tpu.dma_semaphore, #tpu.memory_space<semaphore_mem>>
    tpu.wait_dma2 semaphore(%45 : memref<!tpu.dma_semaphore, #tpu.memory_space<semaphore_mem>>) src(%arg2 : memref<128x128xf32, #tpu.memory_space<any>>) dst(%43 : memref<128x128xf32, #tpu.memory_space<vmem>>)
    %c1 = arith.constant 1 : index
    %c0_33 = arith.constant 0 : index
    %c0_34 = arith.constant 0 : index
    %46 = vector.load %arg10[%c1, %c0_33, %c0_34] : memref<2x128x128xf32, #tpu.memory_space<vmem>>, vector<1x128x128xf32>
    %47 = vector.shape_cast %46 : vector<1x128x128xf32> to vector<128x128xf32>
    %cst_35 = arith.constant dense<0.000000e+00> : vector<8x128xf32>
    %48 = tpu.matmul %37, %47, %cst_35 {dimension_numbers = #tpu.dot_dimension_numbers<[1], [0], [0], [1], [0, 0, 1, 1], [], []>} : vector<8x128xf32>, vector<128x128xf32>, vector<8x128xf32> -> vector<8x128xf32>
    %cst_36 = arith.constant dense<0.000000e+00> : vector<1x128xf32>
    %49 = tpu.matmul %4, %48, %cst_36 {dimension_numbers = #tpu.dot_dimension_numbers<[1], [0], [0], [1], [0, 0, 1, 1], [], []>} : vector<1x8xf32>, vector<8x128xf32>, vector<1x128xf32> -> vector<1x128xf32>
    %cst_37 = arith.constant 1.250000e-01 : f32
    %50 = vector.broadcast %cst_37 : f32 to vector<1x128xf32>
    %51 = arith.mulf %49, %50 : vector<1x128xf32>
    %52 = vector.broadcast %51 : vector<1x128xf32> to vector<8x128xf32>
    %53 = arith.subf %48, %52 : vector<8x128xf32>
    %54 = arith.mulf %53, %53 : vector<8x128xf32>
    %cst_38 = arith.constant dense<0.000000e+00> : vector<1x128xf32>
    %55 = tpu.matmul %4, %54, %cst_38 {dimension_numbers = #tpu.dot_dimension_numbers<[1], [0], [0], [1], [0, 0, 1, 1], [], []>} : vector<1x8xf32>, vector<8x128xf32>, vector<1x128xf32> -> vector<1x128xf32>
    %cst_39 = arith.constant 1.250000e-01 : f32
    %56 = vector.broadcast %cst_39 : f32 to vector<1x128xf32>
    %57 = arith.mulf %55, %56 : vector<1x128xf32>
    %cst_40 = arith.constant 9.99999974E-6 : f32
    %58 = vector.broadcast %cst_40 : f32 to vector<1x128xf32>
    %59 = arith.addf %57, %58 : vector<1x128xf32>
    %60 = math.rsqrt %59 : vector<1x128xf32>
    %c0_41 = arith.constant 0 : index
    %c0_42 = arith.constant 0 : index
    %61 = vector.load %arg6[%c0_41, %c0_42] : memref<1x128xf32, #tpu.memory_space<vmem>>, vector<1x128xf32>
    %62 = arith.mulf %60, %61 : vector<1x128xf32>
    %63 = vector.broadcast %62 : vector<1x128xf32> to vector<8x128xf32>
    %64 = arith.mulf %53, %63 : vector<8x128xf32>
    %c0_43 = arith.constant 0 : index
    %c0_44 = arith.constant 0 : index
    %65 = vector.load %arg7[%c0_43, %c0_44] : memref<1x128xf32, #tpu.memory_space<vmem>>, vector<1x128xf32>
    %66 = vector.broadcast %65 : vector<1x128xf32> to vector<8x128xf32>
    %67 = arith.addf %64, %66 : vector<8x128xf32>
    %cst_45 = arith.constant 0.000000e+00 : f32
    %68 = vector.broadcast %cst_45 : f32 to vector<8x128xf32>
    %69 = arith.maximumf %67, %68 : vector<8x128xf32>
    %c0_i32_46 = arith.constant 0 : i32
    %c0_i32_47 = arith.constant 0 : i32
    %c0_i32_48 = arith.constant 0 : i32
    %c0_i32_49 = arith.constant 0 : i32
    %70 = tpu.memref_slice %arg10[%c0_i32_46, %c0_i32_48, %c0_i32_49] : memref<2x128x128xf32, #tpu.memory_space<vmem>> -> memref<1x128x128xf32, #tpu.memory_space<vmem>>
    %71 = tpu.memref_squeeze %70 : memref<1x128x128xf32, #tpu.memory_space<vmem>> -> memref<128x128xf32, #tpu.memory_space<vmem>>
    %72 = tpu.memref_slice %arg11[%c0_i32_47] : memref<2x!tpu.dma_semaphore, #tpu.memory_space<semaphore_mem>> -> memref<1x!tpu.dma_semaphore, #tpu.memory_space<semaphore_mem>>
    %73 = tpu.memref_squeeze %72 : memref<1x!tpu.dma_semaphore, #tpu.memory_space<semaphore_mem>> -> memref<!tpu.dma_semaphore, #tpu.memory_space<semaphore_mem>>
    tpu.wait_dma2 semaphore(%73 : memref<!tpu.dma_semaphore, #tpu.memory_space<semaphore_mem>>) src(%arg3 : memref<128x128xf32, #tpu.memory_space<any>>) dst(%71 : memref<128x128xf32, #tpu.memory_space<vmem>>)
    %c0_50 = arith.constant 0 : index
    %c0_51 = arith.constant 0 : index
    %c0_52 = arith.constant 0 : index
    %74 = vector.load %arg10[%c0_50, %c0_51, %c0_52] : memref<2x128x128xf32, #tpu.memory_space<vmem>>, vector<1x128x128xf32>
    %75 = vector.shape_cast %74 : vector<1x128x128xf32> to vector<128x128xf32>
    %cst_53 = arith.constant dense<0.000000e+00> : vector<8x128xf32>
    %76 = tpu.matmul %69, %75, %cst_53 {dimension_numbers = #tpu.dot_dimension_numbers<[1], [0], [0], [1], [0, 0, 1, 1], [], []>} : vector<8x128xf32>, vector<128x128xf32>, vector<8x128xf32> -> vector<8x128xf32>
    %c0_54 = arith.constant 0 : index
    %c0_55 = arith.constant 0 : index
    %77 = vector.load %arg8[%c0_54, %c0_55] : memref<1x128xf32, #tpu.memory_space<vmem>>, vector<1x128xf32>
    %78 = vector.broadcast %77 : vector<1x128xf32> to vector<8x128xf32>
    %79 = arith.addf %76, %78 : vector<8x128xf32>
    %c0_56 = arith.constant 0 : index
    %c0_57 = arith.constant 0 : index
    %80 = vector.load %arg9[%c0_56, %c0_57] : memref<8x128xf32, #tpu.memory_space<vmem>>, vector<8x128xf32>
    tpu.vector_store %arg9[%c0_56, %c0_57], %79 {strides = array<i32>} : memref<8x128xf32, #tpu.memory_space<vmem>>, vector<8x128xf32>,
    return
  }
}

</mosaic_0001>

<bundles_post_ra>
// kernel: mlp_forward.1
= control target key start
LH: loop header
LB: loop body
LE: loop exit
PB: predicated region body
PF: predicated region fallthrough
CT: control target
= control target key end

     0   :  { %14 = vsyncpa [#allocation5], 0  ;;  %s1071_s11 = smov [#allocation2]   ;;  %s1072_s13 = smov [#allocation2 + $0x80]   ;;  %s1285_s0 = inlined_call_operand.vmem [shape: f32[8,128], index: 0, kind: input, shape index: {}]   ;;  %s1286_s1 = inlined_call_operand.hbm [shape: f32[128,128], index: 1, kind: input, shape index: {}]   ;;  %s1287_s2 = inlined_call_operand.hbm [shape: f32[128,128], index: 2, kind: input, shape index: {}]   ;;  %s1288_s3 = inlined_call_operand.hbm [shape: f32[128,128], index: 3, kind: input, shape index: {}]   ;;  %s1289_s4 = inlined_call_operand.vmem [shape: f32[1,128], index: 4, kind: input, shape index: {}]   ;;  %s1290_s5 = inlined_call_operand.vmem [shape: f32[1,128], index: 5, kind: input, shape index: {}]   ;;  %s1291_s6 = inlined_call_operand.vmem [shape: f32[1,128], index: 6, kind: input, shape index: {}]   ;;  %s1292_s7 = inlined_call_operand.vmem [shape: f32[1,128], index: 7, kind: input, shape index: {}]   ;;  %s1293_s8 = inlined_call_operand.vmem [shape: f32[1,128], index: 8, kind: input, shape index: {}]   ;;  %s1294_s9 = inlined_call_operand.hbm [shape: f32[8,128], index: 9, kind: output, shape index: {}]  }
   0x1   :  { %v1131_v0 = vld [vmem:[%s1285_s0] sm:$0xff]  ;;  %s34_s12 = sshll.u32 %s1071_s11, 4  ;;  %s48_s14 = sshll.u32 %s1072_s13, 4  ;;  %s1133_s12 = int_to_ptr.vmem [resolvable:$true] %s34_s12  ;;  %s49_s14 = int_to_ptr.vmem [resolvable:$true] %s48_s14 }
   0x2   :  { %s975_s17 = scalar_lea.hbm %s1286_s1, 2048 }
   0x3   :  { %p976_p0 = scmp.ne.s32.totalorder %s1286_s1, %s975_s17  ;;  %p979_p1 = scmp.lt.u32.totalorder %s975_s17, %s1286_s1 }
   0x5   :  { %p981_p2 = pnand %p979_p1, %p976_p0 }
   0x7   :  { %984 = shalt.err (!%p981_p2)  }
   0x8   :  { %s985_s0 = scalar_lea.vmem %s1133_s12, 2048  ;;  %s989_s23 = scalar_lea.vmem %s1133_s12, 4096 }
   0x9   :  { %p1146_p3 = scmp.ne.s32.totalorder %s1133_s12, %s985_s0  ;;  %p990_p4 = scmp.lt.s32.totalorder %s1133_s12, %s1133_s12 }
   0xa   :  { %p991_p5 = scmp.lt.s32.totalorder %s989_s23, %s985_s0 }
   0xc   :  { %p1153_p6 = por %p991_p5, %p990_p4 }
   0xe   :  { %p993_p7 = pnand %p1153_p6, %p1146_p3 }
  0x10   :  { %996 = shalt.err (!%p993_p7)  }
  0x11   :  { %37 = dma.hbm_to_vmem [thread:$0]  %s1286_s1, 2048, %s1133_s12, [#allocation3] }
  0x12   :  { %s997_s29 = scalar_lea.hbm %s1287_s2, 2048 }
  0x13   :  { %p998_p8 = scmp.ne.s32.totalorder %s1287_s2, %s997_s29  ;;  %p1001_p9 = scmp.lt.u32.totalorder %s997_s29, %s1287_s2 }
  0x15   :  { %p1003_p10 = pnand %p1001_p9, %p998_p8 }
  0x17   :  { %1006 = shalt.err (!%p1003_p10)  }
  0x18   :  { %s1007_s15 = scalar_lea.vmem %s49_s14, 2048  ;;  %p1012_p12 = scmp.lt.s32.totalorder %s49_s14, %s1133_s12 }
  0x19   :  { %p1008_p11 = scmp.ne.s32.totalorder %s49_s14, %s1007_s15  ;;  %p1013_p13 = scmp.lt.s32.totalorder %s989_s23, %s1007_s15 }
  0x1b   :  { %p1014_p0 = por %p1013_p13, %p1012_p12 }
  0x1d   :  { %p1015_p1 = pnand %p1014_p0, %p1008_p11 }
  0x1f   :  { %1018 = shalt.err (!%p1015_p1)  }
  0x20   :  { %51 = dma.hbm_to_vmem [thread:$0]  %s1287_s2, 2048, %s49_s14, [#allocation3 + $0x1] }
  0x21   :  { %1063 = dma.done.wait [#allocation3], 2048 }
  0x22   :  { %1064 = vsyncadd [#allocation3], 4294965248  ;;  %v1073_v1 = vmov 0.0|0.0   ;;  %vm1074_vm0 = vmmov 0   ;;  %v1075_v2 = vmov 0.0   ;;  %v55_v3 = vld [vmem:[#allocation2] sm:$0xff] }
  0x23   :  { %892 = vmatprep.subr.bf16.mxu0 %v1073_v1  ;;  %799 = vmatprep.mubr.msk.f32.mxu0 %vm1074_vm0, %v1075_v2  ;;  %v56_v4 = vld [vmem:[#allocation2 + $0x8] sm:$0xff]  ;;  %v57_v5 = vld [vmem:[#allocation2 + $0x10] sm:$0xff]  ;;  %v58_v7 = vld [vmem:[#allocation2 + $0x18] sm:$0xff]  ;;  %s1019_s17 = scalar_lea.hbm %s1288_s3, 2048 }
  0x24   :  { %v893_v6 = vpack.c.bf16 %v56_v4, %v55_v3  ;;  %v59_v8 = vld [vmem:[#allocation2 + $0x20] sm:$0xff]  ;;  %v60_v9 = vld [vmem:[#allocation2 + $0x28] sm:$0xff]  ;;  %v896_v10 = vpack.c.bf16 %v58_v7, %v57_v5  ;;  %v61_v11 = vld [vmem:[#allocation2 + $0x30] sm:$0xff]  ;;  %p1020_p2 = scmp.ne.s32.totalorder %s1288_s3, %s1019_s17  ;;  %p1023_p4 = scmp.lt.u32.totalorder %s1019_s17, %s1288_s3 }
  0x25   :  { %v62_v12 = vld [vmem:[#allocation2 + $0x38] sm:$0xff]  ;;  %v63_v13 = vld [vmem:[#allocation2 + $0x40] sm:$0xff]  ;;  %v64_v14 = vld [vmem:[#allocation2 + $0x48] sm:$0xff] }
  0x26   :  { %894 = vmatpush3.bf16.msra.mxu0 %v893_v6  ;;  %v65_v15 = vld [vmem:[#allocation2 + $0x50] sm:$0xff]  ;;  %v66_v16 = vld [vmem:[#allocation2 + $0x58] sm:$0xff]  ;;  %v67_v17 = vld [vmem:[#allocation2 + $0x60] sm:$0xff]  ;;  %p1025_p5 = pnand %p1023_p4, %p1020_p2 }
  0x27   :  { %895 = vmatprep.subr.bf16.mxu0 %v1073_v1  ;;  %v68_v18 = vld [vmem:[#allocation2 + $0x68] sm:$0xff]  ;;  %v69_v19 = vld [vmem:[#allocation2 + $0x70] sm:$0xff]  ;;  %v70_v20 = vld [vmem:[#allocation2 + $0x78] sm:$0xff] }
  0x28   :  { %1028 = shalt.err (!%p1025_p5)  }
  0x29   :  { %1040 = shalt.err (!%p993_p7)  }
  0x2a   :  { %321 = dma.hbm_to_vmem [thread:$0]  %s1288_s3, 2048, %s1133_s12, [#allocation3]  ;;  %897 = vmatpush3.bf16.msra.mxu0 %v896_v10  ;;  %v899_v21 = vpack.c.bf16 %v60_v9, %v59_v8  ;;  %v902_v22 = vpack.c.bf16 %v62_v12, %v61_v11  ;;  %v905_v23 = vpack.c.bf16 %v64_v14, %v63_v13  ;;  %v908_v24 = vpack.c.bf16 %v66_v16, %v65_v15  ;;  %v295_v43 = vld [vmem:[%s1289_s4] sm:$0x1] }
  0x2b   :  { %898 = vmatprep.subr.bf16.mxu0 %v1073_v1  ;;  %v911_v25 = vpack.c.bf16 %v68_v18, %v67_v17  ;;  %v914_v26 = vpack.c.bf16 %v70_v20, %v69_v19  ;;  %vm141_vm1 = vcmask 64512   ;;  %v1076_v29 = vmov 1.0   ;;  %v701_v47 = vld [vmem:[%s1290_s5] ss:$0 sm:$0xff] }
  0x2c   :  { %v216_v30 = vlaneseq }
  0x2e   :  { %900 = vmatpush3.bf16.msra.mxu0 %v899_v21  ;;  %v217_v31 = vshrl.u32 %v216_v30, 7 }
  0x2f   :  { %901 = vmatprep.subr.bf16.mxu0 %v1073_v1 }
  0x30   :  { %v1220_v32 = vsub.s32 0, %v217_v31 }
  0x32   :  { %903 = vmatpush3.bf16.msra.mxu0 %v902_v22 }
  0x33   :  { %904 = vmatprep.subr.bf16.mxu0 %v1073_v1 }
  0x36   :  { %906 = vmatpush3.bf16.msra.mxu0 %v905_v23 }
  0x37   :  { %907 = vmatprep.subr.bf16.mxu0 %v1073_v1 }
  0x3a   :  { %909 = vmatpush3.bf16.msra.mxu0 %v908_v24 }
  0x3b   :  { %910 = vmatprep.subr.bf16.mxu0 %v1073_v1 }
  0x3e   :  { %912 = vmatpush3.bf16.msra.mxu0 %v911_v25 }
  0x3f   :  { %913 = vmatprep.subr.bf16.mxu0 %v1073_v1 }
  0x42   :  { %915 = vmatpush3.bf16.msra.mxu0 %v914_v26 }
  0x43   :  { %802 = vmatprep.subr.mxu0 %v1075_v2 }
  0x45   :  { %800 = vmatmul.mubr.f32.vlgmr.msra.gmra.mrb[0].mxu0 %v1131_v0 }
  0x46   :  { %804 = vmatprep.mubr.msk.f32.mxu0 %vm1074_vm0, %v1075_v2 }
 0x118   :  { %v137_v27 = vpop.f32.mrb[0].mxu0 }
 0x119   :  { %v801_v28 = vpop.f32.mrb[1].mxu0  ;;  %803 = vmatpush3.msra.mxu0 %v137_v27 }
 0x11a   :  { %805 = vmatmul.mubr.msk.f32.vlgmr.msra.gmra.mrb[2].mxu0 %vm141_vm1, %v1076_v29  ;;  %807 = vmatprep.subr.mxu0 %v1075_v2 }
 0x11b   :  { %809 = vmatprep.mubr.msk.f32.mxu0 %vm1074_vm0, %v1075_v2 }
 0x1ed   :  { %v211_v33 = vpop.f32.mrb[2].mxu0 }
 0x1ee   :  { %v215_v34 = vmul.f32 0.125, %v211_v33  ;;  %v806_v35 = vpop.f32.mrb[3].mxu0 }
 0x1f0   :  { %v219_v36 = vrot.slane %v215_v34, %v1220_v32 }
 0x1f2   :  { %v220_v37 = vsub.f32 %v137_v27, %v219_v36 }
 0x1f4   :  { %v221_v38 = vmul.f32 %v220_v37, %v220_v37 }
 0x1f6   :  { %808 = vmatpush3.msra.mxu0 %v221_v38 }
 0x1f7   :  { %810 = vmatmul.mubr.msk.f32.vlgmr.msra.gmra.mrb[4].mxu0 %vm141_vm1, %v1076_v29 }
 0x2ca   :  { %v288_v39 = vpop.f32.mrb[4].mxu0 }
 0x2cb   :  { %v292_v40 = vmul.f32 0.125, %v288_v39  ;;  %v811_v41 = vpop.f32.mrb[5].mxu0 }
 0x2cd   :  { %v293_v42 = vadd.f32 1e-05, %v292_v40 }
 0x2cf   :  { %971 = vrsqrt.f32 %v293_v42 }
 0x2d9   :  { %v972_v44 = vpop.eup %971 }
 0x2da   :  { %v296_v45 = vmul.f32 %v972_v44, %v295_v43 }
 0x2dc   :  { %v300_v46 = vrot.slane %v296_v45, %v1220_v32 }
 0x2de   :  { %v301_v48 = vmul.f32 %v300_v46, %v220_v37 }
 0x2e0   :  { %v309_v49 = vadd.f32 %v701_v47, %v301_v48 }
 0x2e2   :  { %v310_v50 = vmax.f32 %v309_v49, 0.0 }
 0x2e3   :  { %1065 = dma.done.wait [#allocation3 + $0x1], 2048 }
 0x2e4   :  { %1066 = vsyncadd [#allocation3 + $0x1], 4294965248  ;;  %916 = vmatprep.subr.bf16.mxu1 %v1073_v1  ;;  %844 = vmatprep.mubr.msk.f32.mxu1 %vm1074_vm0, %v1075_v2  ;;  %v324_v51 = vld [vmem:[#allocation2 + $0x80] sm:$0xff]  ;;  %v325_v52 = vld [vmem:[#allocation2 + $0x88] sm:$0xff] }
 0x2e5   :  { %847 = vmatprep.subr.mxu0 %v1075_v2  ;;  %849 = vmatprep.mubr.msk.f32.mxu0 %vm1074_vm0, %v1075_v2  ;;  %v326_v53 = vld [vmem:[#allocation2 + $0x90] sm:$0xff]  ;;  %v917_v54 = vpack.c.bf16 %v325_v52, %v324_v51  ;;  %v327_v55 = vld [vmem:[#allocation2 + $0x98] sm:$0xff]  ;;  %v328_v57 = vld [vmem:[#allocation2 + $0xa0] sm:$0xff] }
 0x2e6   :  { %v920_v56 = vpack.c.bf16 %v327_v55, %v326_v53  ;;  %v329_v58 = vld [vmem:[#allocation2 + $0xa8] sm:$0xff]  ;;  %v330_v60 = vld [vmem:[#allocation2 + $0xb0] sm:$0xff]  ;;  %v331_v61 = vld [vmem:[#allocation2 + $0xb8] sm:$0xff] }
 0x2e7   :  { %918 = vmatpush3.bf16.msra.mxu1 %v917_v54  ;;  %v923_v59 = vpack.c.bf16 %v329_v58, %v328_v57  ;;  %v926_v62 = vpack.c.bf16 %v331_v61, %v330_v60  ;;  %v332_v63 = vld [vmem:[#allocation2 + $0xc0] sm:$0xff]  ;;  %v333_v0 = vld [vmem:[#allocation2 + $0xc8] sm:$0xff]  ;;  %v334_v4 = vld [vmem:[#allocation2 + $0xd0] sm:$0xff] }
 0x2e8   :  { %919 = vmatprep.subr.bf16.mxu1 %v1073_v1  ;;  %v929_v3 = vpack.c.bf16 %v333_v0, %v332_v63  ;;  %v335_v5 = vld [vmem:[#allocation2 + $0xd8] sm:$0xff]  ;;  %v336_v7 = vld [vmem:[#allocation2 + $0xe0] sm:$0xff]  ;;  %v337_v8 = vld [vmem:[#allocation2 + $0xe8] sm:$0xff] }
 0x2e9   :  { %v932_v6 = vpack.c.bf16 %v335_v5, %v334_v4  ;;  %v935_v9 = vpack.c.bf16 %v337_v8, %v336_v7  ;;  %v338_v10 = vld [vmem:[#allocation2 + $0xf0] sm:$0xff]  ;;  %v339_v11 = vld [vmem:[#allocation2 + $0xf8] sm:$0xff]  ;;  %v560_v25 = vld [vmem:[%s1291_s6] sm:$0x1] }
 0x2ea   :  { %v938_v12 = vpack.c.bf16 %v339_v11, %v338_v10  ;;  %v704_v30 = vld [vmem:[%s1292_s7] ss:$0 sm:$0xff] }
 0x2eb   :  { %921 = vmatpush3.bf16.msra.mxu1 %v920_v56 }
 0x2ec   :  { %922 = vmatprep.subr.bf16.mxu1 %v1073_v1 }
 0x2ef   :  { %924 = vmatpush3.bf16.msra.mxu1 %v923_v59 }
 0x2f0   :  { %925 = vmatprep.subr.bf16.mxu1 %v1073_v1 }
 0x2f3   :  { %927 = vmatpush3.bf16.msra.mxu1 %v926_v62 }
 0x2f4   :  { %928 = vmatprep.subr.bf16.mxu1 %v1073_v1 }
 0x2f7   :  { %930 = vmatpush3.bf16.msra.mxu1 %v929_v3 }
 0x2f8   :  { %931 = vmatprep.subr.bf16.mxu1 %v1073_v1 }
 0x2fb   :  { %933 = vmatpush3.bf16.msra.mxu1 %v932_v6 }
 0x2fc   :  { %934 = vmatprep.subr.bf16.mxu1 %v1073_v1 }
 0x2ff   :  { %936 = vmatpush3.bf16.msra.mxu1 %v935_v9 }
 0x300   :  { %937 = vmatprep.subr.bf16.mxu1 %v1073_v1 }
 0x303   :  { %939 = vmatpush3.bf16.msra.mxu1 %v938_v12 }
 0x306   :  { %845 = vmatmul.mubr.f32.vlgmr.msra.gmra.mrb[0].mxu1 %v310_v50 }
 0x3d9   :  { %v406_v13 = vpop.f32.mrb[0].mxu1 }
 0x3da   :  { %v846_v14 = vpop.f32.mrb[1].mxu1  ;;  %848 = vmatpush3.msra.mxu0 %v406_v13 }
 0x3db   :  { %850 = vmatmul.mubr.msk.f32.vlgmr.msra.gmra.mrb[6].mxu0 %vm141_vm1, %v1076_v29  ;;  %852 = vmatprep.subr.mxu0 %v1075_v2 }
 0x3dc   :  { %854 = vmatprep.mubr.msk.f32.mxu0 %vm1074_vm0, %v1075_v2 }
 0x4ae   :  { %v476_v15 = vpop.f32.mrb[6].mxu0 }
 0x4af   :  { %v480_v16 = vmul.f32 0.125, %v476_v15  ;;  %v851_v17 = vpop.f32.mrb[7].mxu0 }
 0x4b1   :  { %v484_v18 = vrot.slane %v480_v16, %v1220_v32 }
 0x4b3   :  { %v485_v19 = vsub.f32 %v406_v13, %v484_v18 }
 0x4b5   :  { %v486_v20 = vmul.f32 %v485_v19, %v485_v19 }
 0x4b7   :  { %853 = vmatpush3.msra.mxu0 %v486_v20 }
 0x4b8   :  { %855 = vmatmul.mubr.msk.f32.vlgmr.msra.gmra.mrb[8].mxu0 %vm141_vm1, %v1076_v29 }
 0x58b   :  { %v553_v21 = vpop.f32.mrb[8].mxu0 }
 0x58c   :  { %v557_v22 = vmul.f32 0.125, %v553_v21  ;;  %v856_v23 = vpop.f32.mrb[9].mxu0 }
 0x58e   :  { %v558_v24 = vadd.f32 1e-05, %v557_v22 }
 0x590   :  { %973 = vrsqrt.f32 %v558_v24 }
 0x59a   :  { %v974_v26 = vpop.eup %973 }
 0x59b   :  { %v561_v27 = vmul.f32 %v974_v26, %v560_v25 }
 0x59d   :  { %v565_v28 = vrot.slane %v561_v27, %v1220_v32 }
 0x59f   :  { %v566_v31 = vmul.f32 %v565_v28, %v485_v19 }
 0x5a1   :  { %v574_v33 = vadd.f32 %v704_v30, %v566_v31 }
 0x5a3   :  { %v575_v29 = vmax.f32 %v574_v33, 0.0 }
 0x5a4   :  { %1067 = dma.done.wait [#allocation3], 2048 }
 0x5a5   :  { %1068 = vsyncadd [#allocation3], 4294965248  ;;  %940 = vmatprep.subr.bf16.mxu1 %v1073_v1  ;;  %889 = vmatprep.mubr.msk.f32.mxu1 %vm1074_vm0, %v1075_v2  ;;  %v578_v34 = vld [vmem:[#allocation2] sm:$0xff]  ;;  %v579_v35 = vld [vmem:[#allocation2 + $0x8] sm:$0xff]  ;;  %s1077_s27 = smov [#allocation4]  }
 0x5a6   :  { %v580_v36 = vld [vmem:[#allocation2 + $0x10] sm:$0xff]  ;;  %v941_v37 = vpack.c.bf16 %v579_v35, %v578_v34  ;;  %v581_v38 = vld [vmem:[#allocation2 + $0x18] sm:$0xff]  ;;  %v582_v39 = vld [vmem:[#allocation2 + $0x20] sm:$0xff]  ;;  %s678_s28 = sshll.u32 %s1077_s27, 4  ;;  %s679_s28 = int_to_ptr.vmem [resolvable:$true] %s678_s28 }
 0x5a7   :  { %v944_v32 = vpack.c.bf16 %v581_v38, %v580_v36  ;;  %v583_v40 = vld [vmem:[#allocation2 + $0x28] sm:$0xff]  ;;  %v584_v42 = vld [vmem:[#allocation2 + $0x30] sm:$0xff]  ;;  %v585_v43 = vld [vmem:[#allocation2 + $0x38] sm:$0xff]  ;;  %s1041_s29 = scalar_lea.vmem %s679_s28, 128  ;;  %p1046_p6 = scmp.lt.s32.totalorder %s679_s28, %s679_s28 }
 0x5a8   :  { %942 = vmatpush3.bf16.msra.mxu1 %v941_v37  ;;  %v947_v41 = vpack.c.bf16 %v583_v40, %v582_v39  ;;  %v950_v44 = vpack.c.bf16 %v585_v43, %v584_v42  ;;  %v586_v2 = vld [vmem:[#allocation2 + $0x40] sm:$0xff]  ;;  %v587_v45 = vld [vmem:[#allocation2 + $0x48] sm:$0xff]  ;;  %v588_v47 = vld [vmem:[#allocation2 + $0x50] sm:$0xff]  ;;  %p1042_p3 = scmp.ne.s32.totalorder %s679_s28, %s1041_s29  ;;  %p1047_p7 = scmp.lt.s32.totalorder %s1041_s29, %s1041_s29 }
 0x5a9   :  { %943 = vmatprep.subr.bf16.mxu1 %v1073_v1  ;;  %v953_v46 = vpack.c.bf16 %v587_v45, %v586_v2  ;;  %v589_v48 = vld [vmem:[#allocation2 + $0x58] sm:$0xff]  ;;  %v590_v50 = vld [vmem:[#allocation2 + $0x60] sm:$0xff]  ;;  %v591_v51 = vld [vmem:[#allocation2 + $0x68] sm:$0xff] }
 0x5aa   :  { %v956_v49 = vpack.c.bf16 %v589_v48, %v588_v47  ;;  %v959_v52 = vpack.c.bf16 %v591_v51, %v590_v50  ;;  %v592_v53 = vld [vmem:[#allocation2 + $0x70] sm:$0xff]  ;;  %v593_v54 = vld [vmem:[#allocation2 + $0x78] sm:$0xff]  ;;  %v705_v56 = vld [vmem:[%s1293_s8] ss:$0 sm:$0xff]  ;;  %p1048_p8 = por %p1047_p7, %p1046_p6 }
 0x5ab   :  { %v962_v55 = vpack.c.bf16 %v593_v54, %v592_v53 }
 0x5ac   :  { %945 = vmatpush3.bf16.msra.mxu1 %v944_v32  ;;  %p1049_p9 = pnand %p1048_p8, %p1042_p3 }
 0x5ad   :  { %946 = vmatprep.subr.bf16.mxu1 %v1073_v1 }
 0x5b0   :  { %948 = vmatpush3.bf16.msra.mxu1 %v947_v41 }
 0x5b1   :  { %949 = vmatprep.subr.bf16.mxu1 %v1073_v1 }
 0x5b4   :  { %951 = vmatpush3.bf16.msra.mxu1 %v950_v44 }
 0x5b5   :  { %952 = vmatprep.subr.bf16.mxu1 %v1073_v1 }
 0x5b8   :  { %954 = vmatpush3.bf16.msra.mxu1 %v953_v46 }
 0x5b9   :  { %955 = vmatprep.subr.bf16.mxu1 %v1073_v1 }
 0x5bc   :  { %957 = vmatpush3.bf16.msra.mxu1 %v956_v49 }
 0x5bd   :  { %958 = vmatprep.subr.bf16.mxu1 %v1073_v1 }
 0x5c0   :  { %960 = vmatpush3.bf16.msra.mxu1 %v959_v52 }
 0x5c1   :  { %961 = vmatprep.subr.bf16.mxu1 %v1073_v1 }
 0x5c4   :  { %963 = vmatpush3.bf16.msra.mxu1 %v962_v55 }
 0x5c7   :  { %890 = vmatmul.mubr.f32.vlgmr.msra.gmra.mrb[2].mxu1 %v575_v29 }
 0x69a   :  { %v667_v57 = vpop.f32.mrb[2].mxu1 }
 0x69b   :  { %v668_v58 = vadd.f32 %v705_v56, %v667_v57  ;;  %v891_v59 = vpop.f32.mrb[3].mxu1 }
 0x69d   :  { %671 = vst [vmem:[#allocation4] sm:$0xff] %v668_v58 }
 0x69e   :  { %1052 = shalt.err (!%p1049_p9)
}
 0x69f   :  { %s1053_s11 = scalar_lea.hbm %s1294_s9, 128 }
 0x6a0   :  { %p1054_p10 = scmp.ne.s32.totalorder %s1294_s9, %s1053_s11  ;;  %p1057_p11 = scmp.lt.u32.totalorder %s1053_s11, %s1294_s9 }
 0x6a2   :  { %p1059_p12 = pnand %p1057_p11, %p1054_p10 }
 0x6a4   :  { %1062 = shalt.err (!%p1059_p12)
}
 0x6a5   :  { %681 = dma.vmem_to_hbm [thread:$0]  %s679_s28, 128, %s1294_s9, [#allocation5]  }
 0x6a6   :  { %1069 = dma.done.wait [#allocation5], 128  }
 0x6a7   :  { %1070 = vsyncadd [#allocation5], 4294967168 }
 0x6a8   :  { %685 = vsyncpa [#allocation5], 1 }
 0x6a9   :  { %686 = vsyncmov [#allocation3] }
 0x6ac   :  { %s687_s14 = vpop.sfrf %686 }
 0x6ad   :  { %p706_p13 = scmp.ne.s32.totalorder %s687_s14, 0 }
 0x6af   :  { %691 = shalt.err (%p706_p13)  }
 0x6b0   :  { %693 = vsyncmov [#allocation3 + $0x1] }
 0x6b3   :  { %s694_s17 = vpop.sfrf %693 }
 0x6b4   :  { %p707_p0 = scmp.ne.s32.totalorder %s694_s17, 0 }
 0x6b6   :  { %698 = shalt.err (%p707_p0)  }

</bundles_post_ra>
